<compile_context>
chip_gen: v5e
topology: v5e:2x2
jax: 0.10.0
libtpu: 0.0.40
codegen_flags: <defaults>
</compile_context>

<pallas_src>
import math

import jax
import jax.numpy as jnp
from jax.experimental import pallas as pl
from jax.experimental.pallas import tpu as pltpu


def _round_up(x, m):
    return (x + m - 1) // m * m


# ----------------------------------------------------------------------------
# Kernel
# ----------------------------------------------------------------------------
def critic_kernel(state_ref, action_ref,
                  w1_ref, b1_ref, w2s_ref, w2a_ref, b2_ref,
                  w3_ref, b3_ref, w4t_ref, b4_ref,
                  out_ref):
    """One batch tile of the critic MLP.  Weight/bias refs are VMEM-resident."""
    s = state_ref[...]            # [TB, S]  f32
    a = action_ref[...]           # [TB, A]  f32

    # fcs1 + relu
    h1 = jnp.maximum(
        jnp.dot(s, w1_ref[...], preferred_element_type=jnp.float32)
        + b1_ref[...], 0.0)                                     # [TB, f0]
    # cat((relu(fcs1(s)), action)) @ W_fc1  fused as two matmuls (exact)
    h2 = jnp.maximum(
        jnp.dot(h1, w2s_ref[...], preferred_element_type=jnp.float32)
        + jnp.dot(a, w2a_ref[...], preferred_element_type=jnp.float32)
        + b2_ref[...], 0.0)                                     # [TB, f1]
    # fc2 + relu
    h3 = jnp.maximum(
        jnp.dot(h2, w3_ref[...], preferred_element_type=jnp.float32)
        + b3_ref[...], 0.0)                                     # [TB, f2]

    # fc3, emitted lane-dense: transpose h3 on the XLU, then one
    # [8, f2] x [f2, TB] MXU pass; row 0 of w4t carries the real fc3 weights.
    h3t = h3.T                                                  # [f2, TB]
    q8 = jnp.dot(w4t_ref[...], h3t,
                 preferred_element_type=jnp.float32)            # [8, TB]
    out_ref[...] = q8[0:1, :] + b4_ref[...]                     # [1, TB]


# ----------------------------------------------------------------------------
# Wrapper
# ----------------------------------------------------------------------------
def critic_forward(state, action, params, *, tile_b=2048, single_tile_max=1024):
    """Run the Pallas critic. `params` comes from prepare_params(init_params(...))."""
    # Emulate PyTorch's .squeeze() on the inputs (glue, outside the kernel).
    state = jnp.squeeze(state)
    action = jnp.squeeze(action)
    if state.ndim == 1:
        state = state[None, :]
    if action.ndim == 1:
        action = action[None, :]
    if state.dtype != jnp.float32:
        state = state.astype(jnp.float32)
    if action.dtype != jnp.float32:
        action = action.astype(jnp.float32)

    B, S = state.shape
    A = action.shape[1]
    f0 = params["w1"].shape[1]
    f1 = params["w2s"].shape[1]
    f2 = params["w3"].shape[1]

    # Batch tiling:
    #  * small batches: one full-array tile (block == full dims, no alignment
    #    constraints, no padding, single grid step).
    #  * large batches: 128-multiple tiles (legal lane-dense (1, TB) out block)
    #    and a grid of >= 2 steps; the partial last tile is masked by Pallas.
    if B <= max(single_tile_max, 8):
        TB = B
    else:
        TB = min(_round_up(tile_b, 128), _round_up(pl.cdiv(B, 2), 128))
    grid = pl.cdiv(B, TB)

    weights = (params["w1"], params["b1"], params["w2s"], params["w2a"],
               params["b2"], params["w3"], params["b3"], params["w4t8"],
               params["b4"])
    # Constant index_maps => each weight is DMA'd once and stays VMEM-resident
    # across all batch tiles.
    weight_specs = [pl.BlockSpec(w.shape, lambda i: (0, 0)) for w in weights]

    flops = 2 * B * (S * f0 + f0 * f1 + A * f1 + f1 * f2 + f2)
    weight_bytes = sum(int(w.size) * 4 for w in weights)
    cost = pl.CostEstimate(
        flops=flops,
        transcendentals=0,
        bytes_accessed=B * (S + A + 1) * 4 + weight_bytes)

    out = pl.pallas_call(
        critic_kernel,
        out_shape=jax.ShapeDtypeStruct((1, B), jnp.float32),
        grid_spec=pltpu.PrefetchScalarGridSpec(
            num_scalar_prefetch=0,
            grid=(grid,),
            in_specs=[
                # Batch-tiled streams (double-buffered by the pipeline),
                # native feature widths (== full array dims).
                pl.BlockSpec((TB, S), lambda i: (i, 0)),
                pl.BlockSpec((TB, A), lambda i: (i, 0)),
                *weight_specs,
            ],
            # Lane-dense transposed output: 4 B of writeback per batch row.
            out_specs=pl.BlockSpec((1, TB), lambda i: (0, i)),
        ),
        compiler_params=pltpu.CompilerParams(
            dimension_semantics=("parallel",)),
        cost_estimate=cost,
    )(state, action, *weights)

    # (1, B) -> (B, 1): trivial reshape; no padded columns to slice away.
    return out.reshape(B, 1)


# ----------------------------------------------------------------------------
# Parameter init (mirrors the module's uniform-range scheme) + prep
# ----------------------------------------------------------------------------
def init_params(key, state_size, action_size, fc_units=(50, 150, 50)):
    f0, f1, f2 = fc_units
    ks = jax.random.split(key, 8)

    def u(k, shape, lim):
        return jax.random.uniform(k, shape, jnp.float32, -lim, lim)

    # hidden_init uses fan_in = weight.size()[0] (== out_features in torch).
    lim1 = 1.0 / math.sqrt(f0)
    lim2 = 1.0 / math.sqrt(f1)
    lim3 = 1.0 / math.sqrt(f2)

    w2_full = u(ks[2], (f0 + action_size, f1), lim2)   # [in, out]
    return {
        "w1": u(ks[0], (state_size, f0), lim1),
        "b1": u(ks[1], (1, f0), lim1),
        "w2s": w2_full[:f0, :],      # rows hitting the relu(fcs1) output
        "w2a": w2_full[f0:, :],      # rows hitting the action input
        "b2": u(ks[3], (1, f1), lim2),
        "w3": u(ks[4], (f1, f2), lim3),
        "b3": u(ks[5], (1, f2), lim3),
        "w4": u(ks[6], (f2, 1), 0.003),
        "b4": u(ks[7], (1, 1), 0.003),
    }


def prepare_params(params):
    """Add the kernel-ready 8-row transposed copy of fc3's weight column
    (row 0 real, rows 1..7 zero) used for the lane-dense output MXU pass."""
    f2 = params["w3"].shape[1]
    w4t8 = jnp.zeros((8, f2), jnp.float32).at[0, :].set(params["w4"][:, 0])
    out = dict(params)
    out["w4t8"] = w4t8
    return out


def critic_reference(state, action, params):
    """Pure-JAX reference for correctness checking."""
    h1 = jax.nn.relu(state @ params["w1"] + params["b1"])
    x = jnp.concatenate([h1, action], axis=1)
    w2 = jnp.concatenate([params["w2s"], params["w2a"]], axis=0)
    h2 = jax.nn.relu(x @ w2 + params["b2"])
    h3 = jax.nn.relu(h2 @ params["w3"] + params["b3"])
    return h3 @ params["w4"] + params["b4"]


# ----------------------------------------------------------------------------
if __name__ == "__main__":
    key = jax.random.PRNGKey(0)
    k_p, k_s, k_a, k_s2, k_a2 = jax.random.split(key, 5)

    B, STATE_SIZE, ACTION_SIZE = 8, 24, 2   # small shapes consistent w/ module
    params = prepare_params(init_params(k_p, STATE_SIZE, ACTION_SIZE))

    state = jax.random.normal(k_s, (B, STATE_SIZE), jnp.float32)
    action = jax.random.uniform(k_a, (B, ACTION_SIZE), jnp.float32, -1.0, 1.0)

    q = jax.block_until_ready(critic_forward(state, action, params))
    q_ref = critic_reference(state, action, params)
    assert q.shape == (B, 1)
    assert jnp.allclose(q, q_ref, atol=1e-5, rtol=1e-5)

    # Exercise an unaligned single-tile batch and the multi-tile grid path
    # (3 tiles of 128 with a partial last tile) as well.
    B2 = 300
    state2 = jax.random.normal(k_s2, (B2, STATE_SIZE), jnp.float32)
    action2 = jax.random.uniform(k_a2, (B2, ACTION_SIZE), jnp.float32, -1.0, 1.0)
    q2_ref = critic_reference(state2, action2, params)

    q2a = jax.block_until_ready(critic_forward(state2, action2, params))
    assert q2a.shape == (B2, 1)
    assert jnp.allclose(q2a, q2_ref, atol=1e-5, rtol=1e-5)

    q2b = jax.block_until_ready(
        critic_forward(state2, action2, params, tile_b=128, single_tile_max=64))
    assert q2b.shape == (B2, 1)
    assert jnp.allclose(q2b, q2_ref, atol=1e-5, rtol=1e-5)

    print("KERNEL_OK")
</pallas_src>

<mosaic_0001>
module attributes {stable_mosaic.version = 11 : i64} {
  func.func @critic_kernel(%arg0: i32, %arg1: memref<8x24xf32, #tpu.memory_space<vmem>>, %arg2: memref<8x2xf32, #tpu.memory_space<vmem>>, %arg3: memref<24x50xf32, #tpu.memory_space<vmem>>, %arg4: memref<1x50xf32, #tpu.memory_space<vmem>>, %arg5: memref<50x150xf32, #tpu.memory_space<vmem>>, %arg6: memref<2x150xf32, #tpu.memory_space<vmem>>, %arg7: memref<1x150xf32, #tpu.memory_space<vmem>>, %arg8: memref<150x50xf32, #tpu.memory_space<vmem>>, %arg9: memref<1x50xf32, #tpu.memory_space<vmem>>, %arg10: memref<8x50xf32, #tpu.memory_space<vmem>>, %arg11: memref<1x1xf32, #tpu.memory_space<vmem>>, %arg12: memref<1x8xf32, #tpu.memory_space<vmem>>) attributes {dimension_semantics = [#tpu.dimension_semantics<parallel>], iteration_bounds = array<i64: 1>, scalar_prefetch = 0 : i64, scratch_operands = 0 : i64, tpu.core_type = #tpu.core_type<tc>, window_params = [{transform_indices = @transform_0, window_bounds = array<i64: 8, 24>}, {transform_indices = @transform_1, window_bounds = array<i64: 8, 2>}, {pipeline_mode = #tpu.pipeline_mode<synchronous>, transform_indices = @transform_2, window_bounds = array<i64: 24, 50>}, {pipeline_mode = #tpu.pipeline_mode<synchronous>, transform_indices = @transform_3, window_bounds = array<i64: 1, 50>}, {pipeline_mode = #tpu.pipeline_mode<synchronous>, transform_indices = @transform_4, window_bounds = array<i64: 50, 150>}, {pipeline_mode = #tpu.pipeline_mode<synchronous>, transform_indices = @transform_5, window_bounds = array<i64: 2, 150>}, {pipeline_mode = #tpu.pipeline_mode<synchronous>, transform_indices = @transform_6, window_bounds = array<i64: 1, 150>}, {pipeline_mode = #tpu.pipeline_mode<synchronous>, transform_indices = @transform_7, window_bounds = array<i64: 150, 50>}, {pipeline_mode = #tpu.pipeline_mode<synchronous>, transform_indices = @transform_8, window_bounds = array<i64: 1, 50>}, {pipeline_mode = #tpu.pipeline_mode<synchronous>, transform_indices = @transform_9, window_bounds = array<i64: 8, 50>}, {pipeline_mode = #tpu.pipeline_mode<synchronous>, transform_indices = @transform_10, window_bounds = array<i64: 1, 1>}, {transform_indices = @transform_11, window_bounds = array<i64: 1, 8>}]} {
    %c0 = arith.constant 0 : index
    %c0_0 = arith.constant 0 : index
    %0 = vector.load %arg1[%c0, %c0_0] : memref<8x24xf32, #tpu.memory_space<vmem>>, vector<8x24xf32>
    %c0_1 = arith.constant 0 : index
    %c0_2 = arith.constant 0 : index
    %1 = vector.load %arg2[%c0_1, %c0_2] : memref<8x2xf32, #tpu.memory_space<vmem>>, vector<8x2xf32>
    %c0_3 = arith.constant 0 : index
    %c0_4 = arith.constant 0 : index
    %2 = vector.load %arg3[%c0_3, %c0_4] : memref<24x50xf32, #tpu.memory_space<vmem>>, vector<24x50xf32>
    %cst = arith.constant dense<0.000000e+00> : vector<8x50xf32>
    %3 = tpu.matmul %0, %2, %cst {dimension_numbers = #tpu.dot_dimension_numbers<[1], [0], [0], [1], [0, 0, 1, 1], [], []>} : vector<8x24xf32>, vector<24x50xf32>, vector<8x50xf32> -> vector<8x50xf32>
    %c0_5 = arith.constant 0 : index
    %c0_6 = arith.constant 0 : index
    %4 = vector.load %arg4[%c0_5, %c0_6] : memref<1x50xf32, #tpu.memory_space<vmem>>, vector<1x50xf32>
    %5 = vector.broadcast %4 : vector<1x50xf32> to vector<8x50xf32>
    %6 = arith.addf %3, %5 : vector<8x50xf32>
    %cst_7 = arith.constant 0.000000e+00 : f32
    %7 = vector.broadcast %cst_7 : f32 to vector<8x50xf32>
    %8 = arith.maximumf %6, %7 : vector<8x50xf32>
    %c0_8 = arith.constant 0 : index
    %c0_9 = arith.constant 0 : index
    %9 = vector.load %arg5[%c0_8, %c0_9] : memref<50x150xf32, #tpu.memory_space<vmem>>, vector<50x150xf32>
    %cst_10 = arith.constant dense<0.000000e+00> : vector<8x150xf32>
    %10 = tpu.matmul %8, %9, %cst_10 {dimension_numbers = #tpu.dot_dimension_numbers<[1], [0], [0], [1], [0, 0, 1, 1], [], []>} : vector<8x50xf32>, vector<50x150xf32>, vector<8x150xf32> -> vector<8x150xf32>
    %c0_11 = arith.constant 0 : index
    %c0_12 = arith.constant 0 : index
    %11 = vector.load %arg6[%c0_11, %c0_12] : memref<2x150xf32, #tpu.memory_space<vmem>>, vector<2x150xf32>
    %cst_13 = arith.constant dense<0.000000e+00> : vector<8x150xf32>
    %12 = tpu.matmul %1, %11, %cst_13 {dimension_numbers = #tpu.dot_dimension_numbers<[1], [0], [0], [1], [0, 0, 1, 1], [], []>} : vector<8x2xf32>, vector<2x150xf32>, vector<8x150xf32> -> vector<8x150xf32>
    %13 = arith.addf %10, %12 : vector<8x150xf32>
    %c0_14 = arith.constant 0 : index
    %c0_15 = arith.constant 0 : index
    %14 = vector.load %arg7[%c0_14, %c0_15] : memref<1x150xf32, #tpu.memory_space<vmem>>, vector<1x150xf32>
    %15 = vector.broadcast %14 : vector<1x150xf32> to vector<8x150xf32>
    %16 = arith.addf %13, %15 : vector<8x150xf32>
    %cst_16 = arith.constant 0.000000e+00 : f32
    %17 = vector.broadcast %cst_16 : f32 to vector<8x150xf32>
    %18 = arith.maximumf %16, %17 : vector<8x150xf32>
    %c0_17 = arith.constant 0 : index
    %c0_18 = arith.constant 0 : index
    %19 = vector.load %arg8[%c0_17, %c0_18] : memref<150x50xf32, #tpu.memory_space<vmem>>, vector<150x50xf32>
    %cst_19 = arith.constant dense<0.000000e+00> : vector<8x50xf32>
    %20 = tpu.matmul %18, %19, %cst_19 {dimension_numbers = #tpu.dot_dimension_numbers<[1], [0], [0], [1], [0, 0, 1, 1], [], []>} : vector<8x150xf32>, vector<150x50xf32>, vector<8x50xf32> -> vector<8x50xf32>
    %c0_20 = arith.constant 0 : index
    %c0_21 = arith.constant 0 : index
    %21 = vector.load %arg9[%c0_20, %c0_21] : memref<1x50xf32, #tpu.memory_space<vmem>>, vector<1x50xf32>
    %22 = vector.broadcast %21 : vector<1x50xf32> to vector<8x50xf32>
    %23 = arith.addf %20, %22 : vector<8x50xf32>
    %cst_22 = arith.constant 0.000000e+00 : f32
    %24 = vector.broadcast %cst_22 : f32 to vector<8x50xf32>
    %25 = arith.maximumf %23, %24 : vector<8x50xf32>
    %26 = tpu.transpose %25, [1, 0] : vector<8x50xf32> -> vector<50x8xf32>
    %c0_23 = arith.constant 0 : index
    %c0_24 = arith.constant 0 : index
    %27 = vector.load %arg10[%c0_23, %c0_24] : memref<8x50xf32, #tpu.memory_space<vmem>>, vector<8x50xf32>
    %cst_25 = arith.constant dense<0.000000e+00> : vector<8x8xf32>
    %28 = tpu.matmul %27, %26, %cst_25 {dimension_numbers = #tpu.dot_dimension_numbers<[1], [0], [0], [1], [0, 0, 1, 1], [], []>} : vector<8x50xf32>, vector<50x8xf32>, vector<8x8xf32> -> vector<8x8xf32>
    %29 = vector.extract_strided_slice %28 {offsets = [0, 0], sizes = [1, 8], strides = [1, 1]} : vector<8x8xf32> to vector<1x8xf32>
    %c0_26 = arith.constant 0 : index
    %c0_27 = arith.constant 0 : index
    %30 = vector.load %arg11[%c0_26, %c0_27] : memref<1x1xf32, #tpu.memory_space<vmem>>, vector<1x1xf32>
    %31 = vector.broadcast %30 : vector<1x1xf32> to vector<1x8xf32>
    %32 = arith.addf %29, %31 : vector<1x8xf32>
    %c0_28 = arith.constant 0 : index
    %c0_29 = arith.constant 0 : index
    %33 = vector.load %arg12[%c0_28, %c0_29] : memref<1x8xf32, #tpu.memory_space<vmem>>, vector<1x8xf32>
    tpu.vector_store %arg12[%c0_28, %c0_29], %32 {strides = array<i32>} : memref<1x8xf32, #tpu.memory_space<vmem>>, vector<1x8xf32>,
    return
  }
  func.func @transform_0(%arg0: i32) -> (i32, i32) {
    %c0_i32 = arith.constant 0 : i32
    %c0_i32_0 = arith.constant 0 : i32
    return %arg0, %c0_i32 : i32, i32
  }
  func.func @transform_1(%arg0: i32) -> (i32, i32) {
    %c0_i32 = arith.constant 0 : i32
    %c0_i32_0 = arith.constant 0 : i32
    return %arg0, %c0_i32 : i32, i32
  }
  func.func @transform_2(%arg0: i32) -> (i32, i32) {
    %c0_i32 = arith.constant 0 : i32
    %c0_i32_0 = arith.constant 0 : i32
    %c0_i32_1 = arith.constant 0 : i32
    return %c0_i32, %c0_i32_0 : i32, i32
  }
  func.func @transform_3(%arg0: i32) -> (i32, i32) {
    %c0_i32 = arith.constant 0 : i32
    %c0_i32_0 = arith.constant 0 : i32
    %c0_i32_1 = arith.constant 0 : i32
    return %c0_i32, %c0_i32_0 : i32, i32
  }
  func.func @transform_4(%arg0: i32) -> (i32, i32) {
    %c0_i32 = arith.constant 0 : i32
    %c0_i32_0 = arith.constant 0 : i32
    %c0_i32_1 = arith.constant 0 : i32
    return %c0_i32, %c0_i32_0 : i32, i32
  }
  func.func @transform_5(%arg0: i32) -> (i32, i32) {
    %c0_i32 = arith.constant 0 : i32
    %c0_i32_0 = arith.constant 0 : i32
    %c0_i32_1 = arith.constant 0 : i32
    return %c0_i32, %c0_i32_0 : i32, i32
  }
  func.func @transform_6(%arg0: i32) -> (i32, i32) {
    %c0_i32 = arith.constant 0 : i32
    %c0_i32_0 = arith.constant 0 : i32
    %c0_i32_1 = arith.constant 0 : i32
    return %c0_i32, %c0_i32_0 : i32, i32
  }
  func.func @transform_7(%arg0: i32) -> (i32, i32) {
    %c0_i32 = arith.constant 0 : i32
    %c0_i32_0 = arith.constant 0 : i32
    %c0_i32_1 = arith.constant 0 : i32
    return %c0_i32, %c0_i32_0 : i32, i32
  }
  func.func @transform_8(%arg0: i32) -> (i32, i32) {
    %c0_i32 = arith.constant 0 : i32
    %c0_i32_0 = arith.constant 0 : i32
    %c0_i32_1 = arith.constant 0 : i32
    return %c0_i32, %c0_i32_0 : i32, i32
  }
  func.func @transform_9(%arg0: i32) -> (i32, i32) {
    %c0_i32 = arith.constant 0 : i32
    %c0_i32_0 = arith.constant 0 : i32
    %c0_i32_1 = arith.constant 0 : i32
    return %c0_i32, %c0_i32_0 : i32, i32
  }
  func.func @transform_10(%arg0: i32) -> (i32, i32) {
    %c0_i32 = arith.constant 0 : i32
    %c0_i32_0 = arith.constant 0 : i32
    %c0_i32_1 = arith.constant 0 : i32
    return %c0_i32, %c0_i32_0 : i32, i32
  }
  func.func @transform_11(%arg0: i32) -> (i32, i32) {
    %c0_i32 = arith.constant 0 : i32
    %c0_i32_0 = arith.constant 0 : i32
    return %c0_i32, %arg0 : i32, i32
  }
}

</mosaic_0001>

<bundles_post_ra>
// kernel: tpu_custom_call.1
= control target key start
LH: loop header
LB: loop body
LE: loop exit
PB: predicated region body
PF: predicated region fallthrough
CT: control target
= control target key end

     0   :  { %s573_s0 = inlined_call_operand.vmem [shape: f32[8,24], index: 0, kind: input, shape index: {}]   ;;  %s574_s1 = inlined_call_operand.vmem [shape: f32[8,2], index: 1, kind: input, shape index: {}]   ;;  %s575_s2 = inlined_call_operand.vmem [shape: f32[24,50], index: 2, kind: input, shape index: {}]   ;;  %s576_s3 = inlined_call_operand.vmem [shape: f32[1,50], index: 3, kind: input, shape index: {}]   ;;  %s577_s4 = inlined_call_operand.vmem [shape: f32[50,150], index: 4, kind: input, shape index: {}]   ;;  %s578_s5 = inlined_call_operand.vmem [shape: f32[2,150], index: 5, kind: input, shape index: {}]   ;;  %s579_s6 = inlined_call_operand.vmem [shape: f32[1,150], index: 6, kind: input, shape index: {}]   ;;  %s580_s7 = inlined_call_operand.vmem [shape: f32[150,50], index: 7, kind: input, shape index: {}]   ;;  %s581_s8 = inlined_call_operand.vmem [shape: f32[1,50], index: 8, kind: input, shape index: {}]   ;;  %s582_s9 = inlined_call_operand.vmem [shape: f32[8,50], index: 9, kind: input, shape index: {}]   ;;  %s583_s10 = inlined_call_operand.<no memory space> [shape: f32[1,1], index: 10, kind: input, shape index: {}]   ;;  %s584_s11 = inlined_call_operand.hbm [shape: f32[1,8], index: 11, kind: output, shape index: {}]  }
   0x1   :  { %v16_v0 = vstv %s583_s10 }
   0x2   :  { %17 = vst [vmem:[#allocation2] sm:$0x1] %v16_v0 }
   0x3   :  { %v45_v1 = vld [vmem:[%s575_s2 + $0x10] sm:$0xff]  ;;  %v44_v2 = vld [vmem:[%s575_s2 + $0x8] sm:$0xff]  ;;  %v89_v3 = vld [vmem:[%s578_s5] sm:$0xf]  ;;  %vm50_vm0 = vcmask 195584  }
   0x4   :  { %67 = vmatpush.msra.mxu0 %v45_v1  ;;  %v43_v4 = vld [vmem:[%s575_s2] sm:$0xff]  ;;  %91 = vst [vmem:[#allocation1] ss:$4 sm:$0xff] %v89_v3 }
   0x5   :  { %v41_v5 = vld [vmem:[%s573_s0] sm:$0xff] }
   0x6   :  { %68 = vmatpush.msra.mxu0 %v44_v2 }
   0x8   :  { %69 = vmatpush.msra.mxu0 %v43_v4 }
   0x9   :  { %18 = vsyncpa [#allocation4], 0  ;;  %328 = vmatmul.msk.f32.vlgmr.msra.gmra.mxu0 %vm50_vm0, %v41_v5  ;;  %vm98_vm1 = vcmask 1041408   ;;  %v87_v6 = vld [vmem:[%s577_s4 + $0x60] sm:$0x3]  ;;  %vm94_vm2 = vcmask 15360  }
   0xa   :  { %v88_v7 = vld [vmem:[%s577_s4 + $0x68] sm:$0x3]  ;;  %v42_v8 = vld [vmem:[%s574_s1] sm:$0xff]  ;;  %v85_v11 = vld [vmem:[%s577_s4 + $0x50] sm:$0xff]  ;;  %vm143_vm3 = vcmask 408576   ;;  %vm230_vm4 = vcmask 1045504  }
   0xb   :  { %v92_v9 = vld.sshfl [vmem:[#allocation1] sm:$0xff pattern:$0x73625140]  ;;  %v93_v10 = vld.sshfl [vmem:[#allocation1 + $0x8] sm:$0xff pattern:$0x73625140] }
   0xc   :  { %329 = vmatpush.msk.msra.mxu1 %vm98_vm1, %v92_v9  ;;  %331 = vmatpush.msk.msra.mxu3 %vm98_vm1, %v93_v10  ;;  %v86_v12 = vld [vmem:[%s577_s4 + $0x58] sm:$0xff]  ;;  %v83_v13 = vld [vmem:[%s577_s4 + $0x40] sm:$0xff]  ;;  %v84_v14 = vld [vmem:[%s577_s4 + $0x48] sm:$0xff]  ;;  %vm226_vm5 = vcmask 179200   ;;  %v372_v60 = vmov 0   ;;  %s373_s27 = smov [#allocation3]  }
   0xd   :  { %330 = vmatmul.msk.f32.vlgmr.msra.gmra.mxu1 %vm94_vm2, %v42_v8  ;;  %332 = vmatmul.msk.f32.vlgmr.msra.gmra.mxu3 %vm94_vm2, %v42_v8  ;;  %v81_v15 = vld [vmem:[%s577_s4 + $0x30] sm:$0xff]  ;;  %v82_v16 = vld [vmem:[%s577_s4 + $0x38] sm:$0xff]  ;;  %v79_v17 = vld [vmem:[%s577_s4 + $0x20] sm:$0xff]  ;;  %s317_s28 = sshll.u32 %s373_s27, 4  ;;  %vm310_vm6 = vcmask 57344   ;;  %s318_s28 = int_to_ptr.vmem [resolvable:$true] %s317_s28 }
   0xe   :  { %333 = vmatpush.msk.msrb.mxu3 %vm98_vm1, %v87_v6  ;;  %335 = vmatpush.msk.msrb.mxu1 %vm98_vm1, %v88_v7  ;;  %v80_v18 = vld [vmem:[%s577_s4 + $0x28] sm:$0xff]  ;;  %v77_v19 = vld [vmem:[%s577_s4 + $0x10] sm:$0xff]  ;;  %v78_v20 = vld [vmem:[%s577_s4 + $0x18] sm:$0xff] }
   0xf   :  { %v75_v21 = vld [vmem:[%s577_s4] sm:$0xff]  ;;  %v76_v22 = vld [vmem:[%s577_s4 + $0x8] sm:$0xff]  ;;  %v218_v23 = vld [vmem:[%s580_s7 + $0x78] sm:$0xff]  ;;  %343 = vset.pattern.permute.xlu0 %v372_v60 }
  0x10   :  { %163 = vmatpush.msrb.mxu3 %v85_v11  ;;  %183 = vmatpush.msrb.mxu1 %v86_v12  ;;  %v217_v24 = vld [vmem:[%s580_s7 + $0x70] sm:$0xff]  ;;  %v216_v25 = vld [vmem:[%s580_s7 + $0x68] sm:$0xff]  ;;  %v215_v26 = vld [vmem:[%s580_s7 + $0x60] sm:$0xff] }
  0x11   :  { %234 = vmatpush.msra.mxu2 %v218_v23  ;;  %v214_v27 = vld [vmem:[%s580_s7 + $0x58] sm:$0xff]  ;;  %v213_v28 = vld [vmem:[%s580_s7 + $0x50] sm:$0xff]  ;;  %v212_v29 = vld [vmem:[%s580_s7 + $0x48] sm:$0xff] }
  0x12   :  { %164 = vmatpush.msrb.mxu3 %v83_v13  ;;  %184 = vmatpush.msrb.mxu1 %v84_v14  ;;  %v211_v30 = vld [vmem:[%s580_s7 + $0x40] sm:$0xff]  ;;  %v210_v31 = vld [vmem:[%s580_s7 + $0x38] sm:$0xff]  ;;  %v209_v36 = vld [vmem:[%s580_s7 + $0x30] sm:$0xff] }
  0x13   :  { %235 = vmatpush.msra.mxu2 %v217_v24  ;;  %v344_v32 = vld [vmem:[%s576_s3] ss:$0 sm:$0xff]  ;;  %v208_v37 = vld [vmem:[%s580_s7 + $0x28] sm:$0xff]  ;;  %v221_v38 = vld [vmem:[%s580_s7 + $0x90] sm:$0x3f] }
  0x14   :  { %165 = vmatpush.msrb.mxu3 %v81_v15  ;;  %185 = vmatpush.msrb.mxu1 %v82_v16  ;;  %v207_v39 = vld [vmem:[%s580_s7 + $0x20] sm:$0xff]  ;;  %v220_v40 = vld [vmem:[%s580_s7 + $0x88] sm:$0xff]  ;;  %v206_v41 = vld [vmem:[%s580_s7 + $0x18] sm:$0xff] }
  0x15   :  { %236 = vmatpush.msra.mxu2 %v216_v25  ;;  %337 = vmatpush.msk.msrb.mxu0 %vm230_vm4, %v221_v38  ;;  %v219_v42 = vld [vmem:[%s580_s7 + $0x80] sm:$0xff]  ;;  %v205_v43 = vld [vmem:[%s580_s7 + $0x10] sm:$0xff]  ;;  %v204_v44 = vld [vmem:[%s580_s7 + $0x8] sm:$0xff] }
  0x16   :  { %166 = vmatpush.msrb.mxu3 %v79_v17  ;;  %186 = vmatpush.msrb.mxu1 %v80_v18  ;;  %v203_v45 = vld [vmem:[%s580_s7] sm:$0xff]  ;;  %v302_v59 = vld [vmem:[#allocation2] sm:$0x1] }
  0x17   :  { %237 = vmatpush.msra.mxu2 %v215_v26  ;;  %268 = vmatpush.msrb.mxu0 %v220_v40  ;;  %v193_v48 = vld [vmem:[%s579_s6] sm:$0x3] }
  0x18   :  { %167 = vmatpush.msrb.mxu3 %v77_v19  ;;  %187 = vmatpush.msrb.mxu1 %v78_v20  ;;  %v196_v49 = vperm.slane %v193_v48, 1  ;;  %v195_v54 = vperm.slane %v193_v48, 0  ;;  %v345_v61 = vld [vmem:[%s581_s8] ss:$0 sm:$0xff]  ;;  %s319_s8 = sshll.u32 %s584_s11, 4  ;;  %s320_s8 = int_to_ptr.hbm [resolvable:$true] %s319_s8 }
  0x19   :  { %238 = vmatpush.msra.mxu2 %v214_v27  ;;  %269 = vmatpush.msrb.mxu0 %v219_v42  ;;  %v275_v3 = vld [vmem:[%s582_s9] sm:$0xff] }
  0x1a   :  { %168 = vmatpush.msrb.mxu3 %v75_v21  ;;  %188 = vmatpush.msrb.mxu1 %v76_v22 }
  0x1b   :  { %239 = vmatpush.msra.mxu2 %v213_v28  ;;  %305 = vperm.xlu0 %343, %v302_v59  }
  0x1d   :  { %240 = vmatpush.msra.mxu2 %v212_v29 }
  0x1f   :  { %241 = vmatpush.msra.mxu2 %v211_v30 }
  0x21   :  { %242 = vmatpush.msra.mxu2 %v210_v31 }
  0x23   :  { %243 = vmatpush.msra.mxu2 %v209_v36 }
  0x25   :  { %244 = vmatpush.msra.mxu2 %v208_v37 }
  0x27   :  { %245 = vmatpush.msra.mxu2 %v207_v39 }
  0x29   :  { %246 = vmatpush.msra.mxu2 %v206_v41 }
  0x2b   :  { %247 = vmatpush.msra.mxu2 %v205_v43 }
  0x2d   :  { %248 = vmatpush.msra.mxu2 %v204_v44 }
  0x2f   :  { %249 = vmatpush.msra.mxu2 %v203_v45 }
  0x86   :  { %v71_v33 = vpop.f32.mrf.mxu0 }
  0x87   :  { %v72_v34 = vadd.f32 %v344_v32, %v71_v33 }
  0x89   :  { %v74_v35 = vmax.f32 %v72_v34, 0.0 }
  0x8a   :  { %v120_v46 = vpop.f32.mrf.mxu1 }
  0x8b   :  { %334 = vmatmul.msk.f32.vlgmr.msrb.gmra.mxu3 %vm143_vm3, %v74_v35  ;;  %336 = vmatmul.msk.f32.vlgmr.msrb.gmra.mxu1 %vm143_vm3, %v74_v35 }
  0x8d   :  { %v306_v4 = vpop.permute.xlu0 %305 }
  0x8e   :  { %v308_v5 = vperm.slane %v306_v4, 0 }
  0x90   :  { %v140_v47 = vpop.f32.mrf.mxu3 }
 0x108   :  { %v190_v50 = vpop.f32.mrf.mxu1 }
 0x109   :  { %v191_v51 = vadd.f32 %v190_v50, %v140_v47 }
 0x10b   :  { %v200_v52 = vadd.f32 %v196_v49, %v191_v51 }
 0x10d   :  { %v202_v53 = vmax.f32 %v200_v52, 0.0 }
 0x10e   :  { %v170_v55 = vpop.f32.mrf.mxu3 }
 0x10f   :  { %v171_v56 = vadd.f32 %v170_v55, %v120_v46  ;;  %338 = vmatmul.msk.f32.vlgmr.msrb.gmra.mxu0 %vm226_vm5, %v202_v53 }
 0x111   :  { %v199_v57 = vadd.f32 %v195_v54, %v171_v56 }
 0x113   :  { %v201_v58 = vmax.f32 %v199_v57, 0.0 }
 0x115   :  { %250 = vmatmul.f32.vlgmr.msra.gmra.mxu2 %v201_v58 }
 0x18c   :  { %v271_v0 = vpop.f32.mrf.mxu0 }
 0x198   :  { %v251_v62 = vpop.f32.mrf.mxu2 }
 0x199   :  { %v252_v63 = vadd.f32 %v345_v61, %v251_v62 }
 0x19b   :  { %v272_v1 = vadd.f32 %v271_v0, %v252_v63 }
 0x19d   :  { %v274_v2 = vmax.f32 %v272_v1, 0.0 }
 0x19f   :  { %339 = vmatpush.xpose.msk.msra.mxu0 %vm143_vm3, %v274_v2 }
 0x1a2   :  { %340 = vmatmul.msk.f32.vlgmr.msra.gmra.mxu0 %vm143_vm3, %v275_v3 }
 0x21f   :  { %v299_v6 = vpop.f32.mrf.mxu0 }
 0x220   :  { %v309_v7 = vadd.f32 %v308_v5, %v299_v6 }
 0x222   :  { %311 = vst.msk [vmem:[#allocation3] sm:$0x1] %vm310_vm6, %v309_v7 }
 0x223   :  { %322 = dma.vmem_to_hbm [thread:$0]  %s318_s28, 16, %s320_s8, [#allocation4]  }
 0x224   :  { %370 = dma.done.wait [#allocation4], 16  }
 0x225   :  { %371 = vsyncadd [#allocation4], 4294967280 }
 0x226   :  { %327 = vsyncpa [#allocation4], 1 }

</bundles_post_ra>
